<compile_context>
chip_gen: v7x
topology: tpu7x:2x2x1
jax: 0.10.0
libtpu: 0.0.40
codegen_flags: <defaults>
</compile_context>

<pallas_src>
import functools

import jax
import jax.numpy as jnp
from jax.experimental import pallas as pl
from jax.experimental.pallas import tpu as pltpu


HIDDEN = 256  # fixed by the CriticSAC module definition


def critic_sac_kernel(x_ref, w1_ref, w2_ref, c_ref, o_ref):
    """One batch tile of the 3-layer MLP.

    c_ref packs the small constants:  row 0 = b1, row 1 = b2,
    row 2 = w3 (as a (1, 256) row), row 3 = [b3, 0, ..., 0].
    """
    x = x_ref[...]                                   # (TB, S)
    c = c_ref[...]                                   # (4, 256)
    b1 = c[0:1, :]                                   # (1, 256)
    b2 = c[1:2, :]                                   # (1, 256)
    w3_row = c[2:3, :]                               # (1, 256)
    b3 = c[3:4, 0:1]                                 # (1, 1)

    # fc1 + ReLU  (MXU matmul with f32 accumulation; bias/ReLU on the VPU)
    h1 = jnp.dot(x, w1_ref[...], preferred_element_type=jnp.float32) + b1
    h1 = jnp.maximum(h1, 0.0)

    # fc2 + ReLU
    h2 = jnp.dot(h1, w2_ref[...], preferred_element_type=jnp.float32) + b2
    h2 = jnp.maximum(h2, 0.0)

    # fc3: single output column -> VPU multiply + XLU lane reduction (no MXU push)
    v = jnp.sum(h2 * w3_row, axis=-1, keepdims=True) + b3   # (TB, 1)

    o_ref[...] = v


@functools.partial(jax.jit, static_argnames=("block_b",))
def critic_sac_forward(x, params, *, block_b=512):
    """x: (..., state_dim) float32 -> (..., 1) float32 (matches CriticSAC.forward)."""
    lead_shape = x.shape[:-1]
    S = x.shape[-1]
    x2 = x.reshape(-1, S)
    B = x2.shape[0]
    H = params["w1"].shape[1]

    # Pack the small per-layer constants into a single (4, H) resident operand.
    b3_row = jnp.pad(params["b3"], ((0, 0), (0, H - params["b3"].shape[1])))
    consts = jnp.concatenate(
        [params["b1"], params["b2"], params["w3"].T, b3_row], axis=0)  # (4, H)

    # Batch tiling: whole batch in one tile when small; otherwise `block_b`-row
    # tiles (multiple of 8 sublanes) with zero padding of the ragged tail.
    if B <= block_b:
        TB, Bp = B, B
        x_p = x2
    else:
        TB = block_b
        Bp = pl.cdiv(B, TB) * TB
        x_p = jnp.pad(x2, ((0, Bp - B), (0, 0)))
    grid = (Bp // TB,)

    out = pl.pallas_call(
        critic_sac_kernel,
        out_shape=jax.ShapeDtypeStruct((Bp, 1), jnp.float32),
        grid=grid,
        in_specs=[
            pl.BlockSpec((TB, S), lambda i: (i, 0)),   # state tiles (pipelined)
            pl.BlockSpec((S, H), lambda i: (0, 0)),    # w1 resident
            pl.BlockSpec((H, H), lambda i: (0, 0)),    # w2 resident
            pl.BlockSpec((4, H), lambda i: (0, 0)),    # packed b1/b2/w3/b3 resident
        ],
        out_specs=pl.BlockSpec((TB, 1), lambda i: (i, 0)),
        compiler_params=pltpu.CompilerParams(
            dimension_semantics=("parallel",),          # megacore on v7x
            vmem_limit_bytes=32 * 1024 * 1024,          # safe vs v7x 64 MiB VMEM
        ),
    )(x_p, params["w1"], params["w2"], consts)

    return out[:B].reshape(*lead_shape, 1)   # (..., 1) — module keeps the last dim


def init_params(key, state_dim):
    """Deterministic init mirroring PyTorch nn.Linear defaults (uniform(+-1/sqrt(fan_in)))."""
    layer_dims = [state_dim, HIDDEN, HIDDEN, 1]
    keys = jax.random.split(key, 2 * (len(layer_dims) - 1))
    params = {}
    for i in range(len(layer_dims) - 1):
        fan_in, fan_out = layer_dims[i], layer_dims[i + 1]
        bound = 1.0 / (fan_in ** 0.5)
        params[f"w{i + 1}"] = jax.random.uniform(
            keys[2 * i], (fan_in, fan_out), jnp.float32, -bound, bound)
        params[f"b{i + 1}"] = jax.random.uniform(
            keys[2 * i + 1], (1, fan_out), jnp.float32, -bound, bound)
    return params


def _reference(x, p):
    h = jnp.maximum(x @ p["w1"] + p["b1"], 0.0)
    h = jnp.maximum(h @ p["w2"] + p["b2"], 0.0)
    return h @ p["w3"] + p["b3"]


if __name__ == "__main__":
    STATE_DIM = 32

    key = jax.random.PRNGKey(0)
    k_param, k_small, k_big = jax.random.split(key, 3)
    params = init_params(k_param, STATE_DIM)

    # Small-shape check (single tile, grid=(1,)).
    x_small = jax.random.normal(k_small, (8, STATE_DIM), jnp.float32)
    y_small = critic_sac_forward(x_small, params)
    jax.block_until_ready(y_small)
    assert y_small.shape == (8, 1), y_small.shape
    assert jnp.allclose(y_small, _reference(x_small, params), atol=1e-5, rtol=1e-5)

    # Larger batch to exercise the batch grid + ragged-tail padding path.
    x_big = jax.random.normal(k_big, (1040, STATE_DIM), jnp.float32)
    y_big = critic_sac_forward(x_big, params)
    jax.block_until_ready(y_big)
    assert y_big.shape == (1040, 1), y_big.shape
    assert jnp.allclose(y_big, _reference(x_big, params), atol=1e-4, rtol=1e-4)

    print("KERNEL_OK")
</pallas_src>

<mosaic_0001>
module attributes {stable_mosaic.version = 11 : i64} {
  func.func @critic_sac_kernel(%arg0: i32, %arg1: memref<8x32xf32, #tpu.memory_space<vmem>>, %arg2: memref<32x256xf32, #tpu.memory_space<vmem>>, %arg3: memref<256x256xf32, #tpu.memory_space<vmem>>, %arg4: memref<4x256xf32, #tpu.memory_space<vmem>>, %arg5: memref<8x1xf32, #tpu.memory_space<vmem>>) attributes {dimension_semantics = [#tpu.dimension_semantics<parallel>], iteration_bounds = array<i64: 1>, scalar_prefetch = 0 : i64, scratch_operands = 0 : i64, tpu.core_type = #tpu.core_type<tc>, window_params = [{transform_indices = @transform_0, window_bounds = array<i64: 8, 32>}, {pipeline_mode = #tpu.pipeline_mode<synchronous>, transform_indices = @transform_1, window_bounds = array<i64: 32, 256>}, {pipeline_mode = #tpu.pipeline_mode<synchronous>, transform_indices = @transform_2, window_bounds = array<i64: 256, 256>}, {pipeline_mode = #tpu.pipeline_mode<synchronous>, transform_indices = @transform_3, window_bounds = array<i64: 4, 256>}, {transform_indices = @transform_4, window_bounds = array<i64: 8, 1>}]} {
    %c0 = arith.constant 0 : index
    %c0_0 = arith.constant 0 : index
    %0 = vector.load %arg1[%c0, %c0_0] : memref<8x32xf32, #tpu.memory_space<vmem>>, vector<8x32xf32>
    %c0_1 = arith.constant 0 : index
    %c0_2 = arith.constant 0 : index
    %1 = vector.load %arg4[%c0_1, %c0_2] : memref<4x256xf32, #tpu.memory_space<vmem>>, vector<4x256xf32>
    %2 = vector.extract_strided_slice %1 {offsets = [0, 0], sizes = [1, 256], strides = [1, 1]} : vector<4x256xf32> to vector<1x256xf32>
    %3 = vector.extract_strided_slice %1 {offsets = [1, 0], sizes = [1, 256], strides = [1, 1]} : vector<4x256xf32> to vector<1x256xf32>
    %4 = vector.extract_strided_slice %1 {offsets = [2, 0], sizes = [1, 256], strides = [1, 1]} : vector<4x256xf32> to vector<1x256xf32>
    %5 = vector.extract_strided_slice %1 {offsets = [3, 0], sizes = [1, 1], strides = [1, 1]} : vector<4x256xf32> to vector<1x1xf32>
    %c0_3 = arith.constant 0 : index
    %c0_4 = arith.constant 0 : index
    %6 = vector.load %arg2[%c0_3, %c0_4] : memref<32x256xf32, #tpu.memory_space<vmem>>, vector<32x256xf32>
    %cst = arith.constant dense<0.000000e+00> : vector<8x256xf32>
    %7 = tpu.matmul %0, %6, %cst {dimension_numbers = #tpu.dot_dimension_numbers<[1], [0], [0], [1], [0, 0, 1, 1], [], []>} : vector<8x32xf32>, vector<32x256xf32>, vector<8x256xf32> -> vector<8x256xf32>
    %8 = vector.broadcast %2 : vector<1x256xf32> to vector<8x256xf32>
    %9 = arith.addf %7, %8 : vector<8x256xf32>
    %cst_5 = arith.constant 0.000000e+00 : f32
    %10 = vector.broadcast %cst_5 : f32 to vector<8x256xf32>
    %11 = arith.maximumf %9, %10 : vector<8x256xf32>
    %c0_6 = arith.constant 0 : index
    %c0_7 = arith.constant 0 : index
    %12 = vector.load %arg3[%c0_6, %c0_7] : memref<256x256xf32, #tpu.memory_space<vmem>>, vector<256x256xf32>
    %cst_8 = arith.constant dense<0.000000e+00> : vector<8x256xf32>
    %13 = tpu.matmul %11, %12, %cst_8 {dimension_numbers = #tpu.dot_dimension_numbers<[1], [0], [0], [1], [0, 0, 1, 1], [], []>} : vector<8x256xf32>, vector<256x256xf32>, vector<8x256xf32> -> vector<8x256xf32>
    %14 = vector.broadcast %3 : vector<1x256xf32> to vector<8x256xf32>
    %15 = arith.addf %13, %14 : vector<8x256xf32>
    %cst_9 = arith.constant 0.000000e+00 : f32
    %16 = vector.broadcast %cst_9 : f32 to vector<8x256xf32>
    %17 = arith.maximumf %15, %16 : vector<8x256xf32>
    %18 = vector.broadcast %4 : vector<1x256xf32> to vector<8x256xf32>
    %19 = arith.mulf %17, %18 : vector<8x256xf32>
    %cst_10 = arith.constant dense<0.000000e+00> : vector<8xf32>
    %20 = vector.multi_reduction <add>, %19, %cst_10 [1] : vector<8x256xf32> to vector<8xf32>
    %21 = vector.shape_cast %20 : vector<8xf32> to vector<8x1xf32>
    %22 = vector.broadcast %5 : vector<1x1xf32> to vector<8x1xf32>
    %23 = arith.addf %21, %22 : vector<8x1xf32>
    %c0_11 = arith.constant 0 : index
    %c0_12 = arith.constant 0 : index
    %24 = vector.load %arg5[%c0_11, %c0_12] : memref<8x1xf32, #tpu.memory_space<vmem>>, vector<8x1xf32>
    tpu.vector_store %arg5[%c0_11, %c0_12], %23 {strides = array<i32>} : memref<8x1xf32, #tpu.memory_space<vmem>>, vector<8x1xf32>,
    return
  }
  func.func @transform_0(%arg0: i32) -> (i32, i32) {
    %c0_i32 = arith.constant 0 : i32
    %c0_i32_0 = arith.constant 0 : i32
    return %arg0, %c0_i32 : i32, i32
  }
  func.func @transform_1(%arg0: i32) -> (i32, i32) {
    %c0_i32 = arith.constant 0 : i32
    %c0_i32_0 = arith.constant 0 : i32
    %c0_i32_1 = arith.constant 0 : i32
    return %c0_i32, %c0_i32_0 : i32, i32
  }
  func.func @transform_2(%arg0: i32) -> (i32, i32) {
    %c0_i32 = arith.constant 0 : i32
    %c0_i32_0 = arith.constant 0 : i32
    %c0_i32_1 = arith.constant 0 : i32
    return %c0_i32, %c0_i32_0 : i32, i32
  }
  func.func @transform_3(%arg0: i32) -> (i32, i32) {
    %c0_i32 = arith.constant 0 : i32
    %c0_i32_0 = arith.constant 0 : i32
    %c0_i32_1 = arith.constant 0 : i32
    return %c0_i32, %c0_i32_0 : i32, i32
  }
  func.func @transform_4(%arg0: i32) -> (i32, i32) {
    %c0_i32 = arith.constant 0 : i32
    %c0_i32_0 = arith.constant 0 : i32
    return %arg0, %c0_i32 : i32, i32
  }
}

</mosaic_0001>

<bundles_post_ra>
// kernel: critic_sac_forward.1
= control target key start
LH: loop header
LB: loop body
LE: loop exit
PB: predicated region body
PF: predicated region fallthrough
CT: control target
= control target key end

     0   :  { %9 = vsyncpa [#allocation3], 0  ;;  %s531_s0 = inlined_call_operand.vmem [shape: f32[8,32], index: 0, kind: input, shape index: {}]   ;;  %s532_s1 = inlined_call_operand.hbm [shape: f32[32,256], index: 1, kind: input, shape index: {}]   ;;  %s533_s2 = inlined_call_operand.hbm [shape: f32[256,256], index: 2, kind: input, shape index: {}]   ;;  %s534_s3 = inlined_call_operand.vmem [shape: f32[4,256], index: 3, kind: input, shape index: {}]   ;;  %s535_s4 = inlined_call_operand.vmem [shape: f32[8,1], index: 4, kind: output, shape index: {}]  }
   0x1   :  { %10 = vsyncpa [#allocation5], 0  ;;  %s468_s15 = smov [#allocation2]   ;;  %s420_s19 = scalar_lea.hbm %s532_s1, 1024 }
   0x2   :  { %s18_s16 = sshll.u32 %s468_s15, 4  ;;  %p421_p0 = scmp.ne.s32.totalorder %s532_s1, %s420_s19  ;;  %s19_s16 = int_to_ptr.vmem [resolvable:$true] %s18_s16 }
   0x3   :  { %p424_p1 = scmp.lt.u32.totalorder %s420_s19, %s532_s1 }
   0x5   :  { %p426_p2 = pnand %p424_p1, %p421_p0 }
   0x7   :  { %429 = shalt.err (!%p426_p2)
}
   0x8   :  { %s430_s24 = scalar_lea.vmem %s19_s16, 1024  ;;  %p435_p4 = scmp.lt.s32.totalorder %s19_s16, %s19_s16 }
   0x9   :  { %p431_p3 = scmp.ne.s32.totalorder %s19_s16, %s430_s24  ;;  %p436_p5 = scmp.lt.s32.totalorder %s430_s24, %s430_s24 }
   0xb   :  { %p437_p6 = por %p436_p5, %p435_p4 }
   0xd   :  { %p438_p7 = pnand %p437_p6, %p431_p3 }
   0xf   :  { %441 = shalt.err (!%p438_p7)
}
  0x10   :  { %s469_s25 = smov 256   ;;  %s470_s26 = smov 16  }
  0x11   :  { %24 = dma.hbm_to_vmem [thread:$0]  %s532_s1, 1024, %s19_s16, [#allocation3], %s469_s25, %s469_s25, %s470_s26  }
  0x12   :  { %s471_s29 = smov [#allocation4]   ;;  %s442_s7 = scalar_lea.hbm %s533_s2, 8192 }
  0x13   :  { %s30_s30 = sshll.u32 %s471_s29, 4  ;;  %p443_p8 = scmp.ne.s32.totalorder %s533_s2, %s442_s7  ;;  %s31_s30 = int_to_ptr.vmem [resolvable:$true] %s30_s30 }
  0x14   :  { %p446_p9 = scmp.lt.u32.totalorder %s442_s7, %s533_s2 }
  0x16   :  { %p448_p10 = pnand %p446_p9, %p443_p8 }
  0x18   :  { %451 = shalt.err (!%p448_p10)
}
  0x19   :  { %s452_s12 = scalar_lea.vmem %s31_s30, 8192  ;;  %p457_p12 = scmp.lt.s32.totalorder %s31_s30, %s31_s30 }
  0x1a   :  { %p453_p11 = scmp.ne.s32.totalorder %s31_s30, %s452_s12  ;;  %p458_p13 = scmp.lt.s32.totalorder %s452_s12, %s452_s12 }
  0x1c   :  { %p459_p0 = por %p458_p13, %p457_p12 }
  0x1e   :  { %p460_p1 = pnand %p459_p0, %p453_p11 }
  0x20   :  { %463 = shalt.err (!%p460_p1)
}
  0x21   :  { %36 = dma.hbm_to_vmem [thread:$0]  %s533_s2, 8192, %s31_s30, [#allocation5], %s469_s25, %s469_s25, %s470_s26  }
  0x22   :  { %464 = dma.done.wait [#allocation3], 1024  }
  0x23   :  { %465 = vsyncadd [#allocation3], 4294966272 }
  0x24   :  { %466 = dma.done.wait [#allocation5], 8192  }
  0x25   :  { %467 = vsyncadd [#allocation5], 4294959104  ;;  %v472_v0 = vmov 0.0   ;;  %v48_v1 = vld [vmem:[#allocation2 + $0x8] sm:$0xff]  ;;  %v50_v2 = vld [vmem:[#allocation2 + $0x18] sm:$0xff]  ;;  %vm74_vm0 = vcmask 261120  }
  0x26   :  { %142 = vmatprep.mubr.f32.mxu0 %v472_v0  ;;  %v47_v3 = vld [vmem:[#allocation2] sm:$0xff]  ;;  %v343_v4 = vpack.c.bf16 %v50_v2, %v48_v1  ;;  %v49_v5 = vld [vmem:[#allocation2 + $0x10] sm:$0xff]  ;;  %v52_v6 = vld [vmem:[#allocation2 + $0x28] sm:$0xff]  ;;  %vm334_vm1 = vcmask 7168  }
  0x27   :  { %v54_v7 = vld [vmem:[#allocation2 + $0x38] sm:$0xff]  ;;  %v345_v8 = vpack.c.bf16 %v49_v5, %v47_v3  ;;  %v51_v10 = vld [vmem:[#allocation2 + $0x20] sm:$0xff]  ;;  %v53_v11 = vld [vmem:[#allocation2 + $0x30] sm:$0xff] }
  0x28   :  { %v347_v9 = vpack.c.bf16 %v54_v7, %v52_v6  ;;  %344 = vmatprep.subr.bf16.mxu0 %v343_v4  ;;  %v152_v12 = vld [vmem:[#allocation4 + $0x8] sm:$0xff]  ;;  %v154_v13 = vld [vmem:[#allocation4 + $0x18] sm:$0xff]  ;;  %v151_v14 = vld [vmem:[#allocation4] sm:$0xff]  ;;  %v349_v15 = vpack.c.bf16 %v53_v11, %v51_v10 }
  0x29   :  { %346 = vmatpush1.bf16.msra.mxu0 %v345_v8  ;;  %v351_v16 = vpack.c.bf16 %v154_v13, %v152_v12  ;;  %v153_v17 = vld [vmem:[#allocation4 + $0x10] sm:$0xff]  ;;  %v156_v18 = vld [vmem:[#allocation4 + $0x28] sm:$0xff]  ;;  %v158_v19 = vld [vmem:[#allocation4 + $0x38] sm:$0xff] }
  0x2a   :  { %348 = vmatprep.subr.bf16.mxu0 %v347_v9  ;;  %v353_v20 = vpack.c.bf16 %v153_v17, %v151_v14  ;;  %v355_v21 = vpack.c.bf16 %v158_v19, %v156_v18  ;;  %v155_v22 = vld [vmem:[#allocation4 + $0x20] sm:$0xff]  ;;  %v157_v23 = vld [vmem:[#allocation4 + $0x30] sm:$0xff]  ;;  %v160_v24 = vld [vmem:[#allocation4 + $0x48] sm:$0xff] }
  0x2b   :  { %352 = vmatprep.subr.bf16.mxu1 %v351_v16  ;;  %v162_v25 = vld [vmem:[#allocation4 + $0x58] sm:$0xff]  ;;  %v357_v26 = vpack.c.bf16 %v157_v23, %v155_v22  ;;  %v45_v27 = vld [vmem:[%s531_s0] sm:$0xff]  ;;  %v161_v30 = vld [vmem:[#allocation4 + $0x50] sm:$0xff] }
  0x2c   :  { %354 = vmatpush1.bf16.msra.mxu1 %v353_v20  ;;  %v359_v28 = vpack.c.bf16 %v162_v25, %v160_v24  ;;  %v159_v29 = vld [vmem:[#allocation4 + $0x40] sm:$0xff]  ;;  %v164_v31 = vld [vmem:[#allocation4 + $0x68] sm:$0xff]  ;;  %v166_v32 = vld [vmem:[#allocation4 + $0x78] sm:$0xff] }
  0x2d   :  { %350 = vmatpush1.bf16.msra.mxu0 %v349_v15  ;;  %356 = vmatprep.subr.bf16.mxu1 %v355_v21  ;;  %v361_v33 = vpack.c.bf16 %v161_v30, %v159_v29  ;;  %v363_v34 = vpack.c.bf16 %v166_v32, %v164_v31  ;;  %v163_v35 = vld [vmem:[#allocation4 + $0x60] sm:$0xff]  ;;  %v165_v36 = vld [vmem:[#allocation4 + $0x70] sm:$0xff]  ;;  %v168_v37 = vld [vmem:[#allocation4 + $0x88] sm:$0xff] }
  0x2e   :  { %v170_v38 = vld [vmem:[#allocation4 + $0x98] sm:$0xff]  ;;  %v365_v39 = vpack.c.bf16 %v165_v36, %v163_v35  ;;  %v167_v41 = vld [vmem:[#allocation4 + $0x80] sm:$0xff]  ;;  %v169_v42 = vld [vmem:[#allocation4 + $0x90] sm:$0xff] }
  0x2f   :  { %v367_v40 = vpack.c.bf16 %v170_v38, %v168_v37  ;;  %v172_v43 = vld [vmem:[#allocation4 + $0xa8] sm:$0xff]  ;;  %v174_v44 = vld [vmem:[#allocation4 + $0xb8] sm:$0xff]  ;;  %v369_v45 = vpack.c.bf16 %v169_v42, %v167_v41  ;;  %v171_v47 = vld [vmem:[#allocation4 + $0xa0] sm:$0xff] }
  0x30   :  { %342 = vmatmul.mubr.msk.f32.vlgmr.msra.gmra.mrb[0].mxu0 %vm74_vm0, %v45_v27  ;;  %358 = vmatpush1.bf16.msra.mxu1 %v357_v26  ;;  %v371_v46 = vpack.c.bf16 %v174_v44, %v172_v43  ;;  %v173_v48 = vld [vmem:[#allocation4 + $0xb0] sm:$0xff]  ;;  %v176_v49 = vld [vmem:[#allocation4 + $0xc8] sm:$0xff]  ;;  %v178_v50 = vld [vmem:[#allocation4 + $0xd8] sm:$0xff] }
  0x31   :  { %360 = vmatprep.subr.bf16.mxu1 %v359_v28  ;;  %v373_v51 = vpack.c.bf16 %v173_v48, %v171_v47  ;;  %v375_v52 = vpack.c.bf16 %v178_v50, %v176_v49  ;;  %v175_v53 = vld [vmem:[#allocation4 + $0xc0] sm:$0xff]  ;;  %v177_v54 = vld [vmem:[#allocation4 + $0xd0] sm:$0xff]  ;;  %v180_v55 = vld [vmem:[#allocation4 + $0xe8] sm:$0xff] }
  0x32   :  { %v182_v56 = vld [vmem:[#allocation4 + $0xf8] sm:$0xff]  ;;  %v377_v57 = vpack.c.bf16 %v177_v54, %v175_v53  ;;  %v179_v59 = vld [vmem:[#allocation4 + $0xe0] sm:$0xff]  ;;  %v181_v60 = vld [vmem:[#allocation4 + $0xf0] sm:$0xff] }
  0x33   :  { %v379_v58 = vpack.c.bf16 %v182_v56, %v180_v55  ;;  %v184_v61 = vld [vmem:[#allocation4 + $0x108] sm:$0xff]  ;;  %v186_v62 = vld [vmem:[#allocation4 + $0x118] sm:$0xff]  ;;  %v381_v63 = vpack.c.bf16 %v181_v60, %v179_v59  ;;  %v183_v1 = vld [vmem:[#allocation4 + $0x100] sm:$0xff] }
  0x34   :  { %362 = vmatpush1.bf16.msra.mxu1 %v361_v33  ;;  %v383_v0 = vpack.c.bf16 %v186_v62, %v184_v61  ;;  %v185_v2 = vld [vmem:[#allocation4 + $0x110] sm:$0xff]  ;;  %v188_v3 = vld [vmem:[#allocation4 + $0x128] sm:$0xff]  ;;  %v190_v4 = vld [vmem:[#allocation4 + $0x138] sm:$0xff] }
  0x35   :  { %364 = vmatprep.subr.bf16.mxu1 %v363_v34  ;;  %v385_v5 = vpack.c.bf16 %v185_v2, %v183_v1  ;;  %v387_v6 = vpack.c.bf16 %v190_v4, %v188_v3  ;;  %v187_v7 = vld [vmem:[#allocation4 + $0x120] sm:$0xff]  ;;  %v189_v8 = vld [vmem:[#allocation4 + $0x130] sm:$0xff]  ;;  %v192_v9 = vld [vmem:[#allocation4 + $0x148] sm:$0xff] }
  0x36   :  { %v194_v10 = vld [vmem:[#allocation4 + $0x158] sm:$0xff]  ;;  %v389_v11 = vpack.c.bf16 %v189_v8, %v187_v7  ;;  %v191_v13 = vld [vmem:[#allocation4 + $0x140] sm:$0xff]  ;;  %v193_v14 = vld [vmem:[#allocation4 + $0x150] sm:$0xff] }
  0x37   :  { %v391_v12 = vpack.c.bf16 %v194_v10, %v192_v9  ;;  %v196_v15 = vld [vmem:[#allocation4 + $0x168] sm:$0xff]  ;;  %v198_v16 = vld [vmem:[#allocation4 + $0x178] sm:$0xff]  ;;  %v393_v17 = vpack.c.bf16 %v193_v14, %v191_v13  ;;  %v195_v19 = vld [vmem:[#allocation4 + $0x160] sm:$0xff] }
  0x38   :  { %366 = vmatpush1.bf16.msra.mxu1 %v365_v39  ;;  %v395_v18 = vpack.c.bf16 %v198_v16, %v196_v15  ;;  %v197_v20 = vld [vmem:[#allocation4 + $0x170] sm:$0xff]  ;;  %v200_v21 = vld [vmem:[#allocation4 + $0x188] sm:$0xff]  ;;  %v202_v22 = vld [vmem:[#allocation4 + $0x198] sm:$0xff] }
  0x39   :  { %368 = vmatprep.subr.bf16.mxu1 %v367_v40  ;;  %v397_v23 = vpack.c.bf16 %v197_v20, %v195_v19  ;;  %v399_v24 = vpack.c.bf16 %v202_v22, %v200_v21  ;;  %v199_v25 = vld [vmem:[#allocation4 + $0x180] sm:$0xff]  ;;  %v201_v26 = vld [vmem:[#allocation4 + $0x190] sm:$0xff]  ;;  %v204_v27 = vld [vmem:[#allocation4 + $0x1a8] sm:$0xff] }
  0x3a   :  { %v206_v28 = vld [vmem:[#allocation4 + $0x1b8] sm:$0xff]  ;;  %v401_v29 = vpack.c.bf16 %v201_v26, %v199_v25  ;;  %v203_v31 = vld [vmem:[#allocation4 + $0x1a0] sm:$0xff]  ;;  %v205_v32 = vld [vmem:[#allocation4 + $0x1b0] sm:$0xff] }
  0x3b   :  { %v403_v30 = vpack.c.bf16 %v206_v28, %v204_v27  ;;  %v208_v33 = vld [vmem:[#allocation4 + $0x1c8] sm:$0xff]  ;;  %v210_v34 = vld [vmem:[#allocation4 + $0x1d8] sm:$0xff]  ;;  %v405_v35 = vpack.c.bf16 %v205_v32, %v203_v31  ;;  %v207_v37 = vld [vmem:[#allocation4 + $0x1c0] sm:$0xff] }
  0x3c   :  { %370 = vmatpush1.bf16.msra.mxu1 %v369_v45  ;;  %v407_v36 = vpack.c.bf16 %v210_v34, %v208_v33  ;;  %v209_v38 = vld [vmem:[#allocation4 + $0x1d0] sm:$0xff]  ;;  %v212_v40 = vld [vmem:[#allocation4 + $0x1e8] sm:$0xff]  ;;  %v214_v41 = vld [vmem:[#allocation4 + $0x1f8] sm:$0xff] }
  0x3d   :  { %372 = vmatprep.subr.bf16.mxu1 %v371_v46  ;;  %v409_v39 = vpack.c.bf16 %v209_v38, %v207_v37  ;;  %v411_v42 = vpack.c.bf16 %v214_v41, %v212_v40  ;;  %v211_v43 = vld [vmem:[#allocation4 + $0x1e0] sm:$0xff]  ;;  %v213_v44 = vld [vmem:[#allocation4 + $0x1f0] sm:$0xff]  ;;  %v56_v46 = vlaneseq }
  0x3e   :  { %v413_v45 = vpack.c.bf16 %v213_v44, %v211_v43  ;;  %v46_v49 = vld [vmem:[%s534_s3] sm:$0xff] }
  0x3f   :  { %v57_v47 = vshrl.u32 %v56_v46, 7 }
  0x40   :  { %374 = vmatpush1.bf16.msra.mxu1 %v373_v51 }
  0x41   :  { %376 = vmatprep.subr.bf16.mxu1 %v375_v52  ;;  %v58_v48 = vsub.s32 0, %v57_v47  ;;  %v62_v50 = vsub.s32 4, %v57_v47  ;;  %v217_v61 = vsub.s32 1, %v57_v47  ;;  %v221_v62 = vsub.s32 5, %v57_v47 }
  0x42   :  { %v312_v2 = vsub.s32 6, %v57_v47 }
  0x43   :  { %v59_v51 = vrot.slane %v46_v49, %v58_v48  ;;  %v63_v52 = vrot.slane %v46_v49, %v62_v50  ;;  %v222_v1 = vrot.slane %v46_v49, %v221_v62 }
  0x44   :  { %378 = vmatpush1.bf16.msra.mxu1 %v377_v57 }
  0x45   :  { %380 = vmatprep.subr.bf16.mxu1 %v379_v58  ;;  %v69_v53 = vrot.slane %v59_v51, %v58_v48  ;;  %v73_v54 = vrot.slane %v63_v52, %v58_v48 }
  0x48   :  { %382 = vmatpush1.bf16.msra.mxu1 %v381_v63  ;;  %v218_v63 = vrot.slane %v46_v49, %v217_v61 }
  0x49   :  { %384 = vmatprep.subr.bf16.mxu1 %v383_v0  ;;  %v308_v0 = vsub.s32 2, %v57_v47 }
  0x4a   :  { %v228_v3 = vrot.slane %v218_v63, %v217_v61 }
  0x4b   :  { %v309_v4 = vrot.slane %v46_v49, %v308_v0 }
  0x4c   :  { %386 = vmatpush1.bf16.msra.mxu1 %v385_v5  ;;  %v232_v5 = vrot.slane %v222_v1, %v217_v61 }
  0x4d   :  { %388 = vmatprep.subr.bf16.mxu1 %v387_v6  ;;  %v313_v6 = vrot.slane %v46_v49, %v312_v2  ;;  %v319_v10 = vrot.slane %v309_v4, %v308_v0 }
  0x50   :  { %390 = vmatpush1.bf16.msra.mxu1 %v389_v11 }
  0x51   :  { %392 = vmatprep.subr.bf16.mxu1 %v391_v12  ;;  %v323_v12 = vrot.slane %v313_v6, %v308_v0 }
  0x54   :  { %394 = vmatpush1.bf16.msra.mxu1 %v393_v17 }
  0x55   :  { %396 = vmatprep.subr.bf16.mxu1 %v395_v18  ;;  %v331_v18 = vsub.s32 3, %v57_v47 }
  0x57   :  { %v332_v19 = vrot.slane %v46_v49, %v331_v18 }
  0x58   :  { %398 = vmatpush1.bf16.msra.mxu1 %v397_v23 }
  0x59   :  { %400 = vmatprep.subr.bf16.mxu1 %v399_v24 }
  0x5c   :  { %402 = vmatpush1.bf16.msra.mxu1 %v401_v29 }
  0x5d   :  { %404 = vmatprep.subr.bf16.mxu1 %v403_v30 }
  0x60   :  { %406 = vmatpush1.bf16.msra.mxu1 %v405_v35 }
  0x61   :  { %408 = vmatprep.subr.bf16.mxu1 %v407_v36 }
  0x64   :  { %410 = vmatpush1.bf16.msra.mxu1 %v409_v39 }
  0x65   :  { %412 = vmatprep.subr.bf16.mxu1 %v411_v42 }
  0x68   :  { %414 = vmatpush1.bf16.msra.mxu1 %v413_v45 }
 0x103   :  { %v144_v55 = vpop.f32.mrb[0].mxu0 }
 0x104   :  { %v145_v56 = vadd.f32 %v144_v55, %v69_v53  ;;  %v146_v57 = vpop.f32.mrb[1].mxu0 }
 0x105   :  { %v147_v58 = vadd.f32 %v146_v57, %v73_v54 }
 0x106   :  { %v149_v60 = vmax.f32 %v145_v56, 0.0 }
 0x107   :  { %v150_v59 = vmax.f32 %v147_v58, 0.0 }
 0x109   :  { %297 = vmatprep.mubr.f32.mxu1 %v150_v59 }
 0x10a   :  { %298 = vmatmul.mubr.f32.vlgmr.msra.gmra.mrb[0].mxu1 %v149_v60 }
 0x1dd   :  { %v299_v7 = vpop.f32.mrb[0].mxu1 }
 0x1de   :  { %v300_v8 = vadd.f32 %v299_v7, %v228_v3  ;;  %v301_v9 = vpop.f32.mrb[1].mxu1 }
 0x1df   :  { %v302_v11 = vadd.f32 %v301_v9, %v232_v5 }
 0x1e0   :  { %v304_v13 = vmax.f32 %v300_v8, 0.0 }
 0x1e1   :  { %v305_v14 = vmax.f32 %v302_v11, 0.0 }
 0x1e2   :  { %v324_v15 = vmul.f32 %v319_v10, %v304_v13 }
 0x1e3   :  { %v325_v16 = vmul.f32 %v323_v12, %v305_v14 }
 0x1e5   :  { %v326_v17 = vadd.f32 %v325_v16, %v324_v15 }
 0x1e7   :  { %327 = vadd.xlane.f32.xlu0 %v326_v17 }
 0x274   :  { %v328_v20 = vpop.xlane.xlu0 %327 }
 0x275   :  { %v333_v21 = vadd.f32 %v332_v19, %v328_v20 }
 0x277   :  { %335 = vst.msk [vmem:[%s535_s4] sm:$0xff] %vm334_vm1, %v333_v21 }
 0x278   :  { %340 = vsyncpa [#allocation3], 1 }
 0x279   :  { %341 = vsyncpa [#allocation5], 1 }

</bundles_post_ra>
